<compile_context>
chip_gen: v6e
topology: v6e:2x2x1
jax: 0.10.0
libtpu: 0.0.40
codegen_flags: <defaults>
</compile_context>

<pallas_src>
import functools

import jax
import jax.numpy as jnp
from jax.experimental import pallas as pl
from jax.experimental.pallas import tpu as pltpu


def _dice_intersection_kernel(logits_ref, targets_ref, out_ref, acc_ref, *,
                              apply_softmax):
    t_idx = pl.program_id(2)

    @pl.when(t_idx == 0)
    def _():
        acc_ref[...] = jnp.zeros_like(acc_ref)

    x = logits_ref[0].astype(jnp.float32)              # (C, TILE): class on sublane
    tgt = targets_ref[0]                               # (1, TILE) int32
    cls = jax.lax.broadcasted_iota(jnp.int32, x.shape, 0)
    mask = cls == tgt                                  # one-hot along class axis

    if apply_softmax:
        m = jnp.max(x, axis=0, keepdims=True)          # (1, TILE)
        e = jnp.exp(x - m)                             # (C, TILE) on EUP
        sum_e = jnp.sum(e, axis=0, keepdims=True)      # (1, TILE)
        e_t = jnp.sum(jnp.where(mask, e, 0.0), axis=0, keepdims=True)
        picked = e_t / sum_e                           # only target class survives
    else:
        picked = jnp.sum(jnp.where(mask, x, 0.0), axis=0, keepdims=True)

    # Lane-parallel partial sums, pure VPU; no per-step cross-lane reduce.
    acc_ref[...] += picked

    @pl.when(t_idx == pl.num_programs(2) - 1)
    def _():
        out_ref[...] = jnp.sum(acc_ref[...]).reshape(1, 1, 1, 1)


def _choose_tile(hw, tile_pixels, num_classes):
    # Keep one logits block <= ~2 MiB so double-buffered inputs comfortably fit
    # the scoped-VMEM default on every generation (v5e 16 MiB .. v7x 32 MiB).
    max_tile_for_vmem = max(128, ((2 * 1024 * 1024) // (num_classes * 4)) // 128 * 128)
    candidate = min(tile_pixels, max_tile_for_vmem)
    if hw <= candidate:
        return hw                                      # full-row block is always legal
    start = candidate - candidate % 128
    for cand in range(start, 0, -128):
        if hw % cand == 0:
            return cand
    raise ValueError("H*W must be a multiple of 128 (or <= the tile budget)")


def multiclass_dice_loss(logits_nchw, targets_nhw, *, num_classes,
                         softmax_dim=None, smooth=1e-6, tile_pixels=8192,
                         num_splits=None):
    # Only softmax over the channel dim (softmax_dim=1 in NCHW) is supported.
    assert softmax_dim in (None, 1), "only channel softmax (dim=1) is supported"
    N, C, H, W = logits_nchw.shape
    assert C == num_classes
    HW = H * W

    tile = _choose_tile(HW, tile_pixels, C)
    n_tiles = HW // tile
    if num_splits is None:
        num_splits = 2 if n_tiles % 2 == 0 else 1      # give v7x's 2nd TC work
    assert n_tiles % num_splits == 0
    t_per_split = n_tiles // num_splits

    # Free reshapes only (no transpose): classes stay on the sublane axis.
    logits_r = logits_nchw.reshape(N, C, HW)
    targets_r = targets_nhw.reshape(N, 1, HW).astype(jnp.int32)

    def in_map(n, s, t):
        return (n, 0, s * t_per_split + t)

    kernel = functools.partial(_dice_intersection_kernel,
                               apply_softmax=(softmax_dim is not None))

    partials = pl.pallas_call(
        kernel,
        out_shape=jax.ShapeDtypeStruct((N, num_splits, 1, 1), jnp.float32),
        grid_spec=pltpu.PrefetchScalarGridSpec(
            num_scalar_prefetch=0,
            grid=(N, num_splits, t_per_split),
            in_specs=[
                pl.BlockSpec((1, C, tile), in_map),
                pl.BlockSpec((1, 1, tile), in_map),
            ],
            out_specs=pl.BlockSpec((1, 1, 1, 1), lambda n, s, t: (n, s, 0, 0)),
            scratch_shapes=[pltpu.VMEM((1, tile), jnp.float32)],
        ),
        compiler_params=pltpu.CompilerParams(
            dimension_semantics=("parallel", "parallel", "arbitrary")),
    )(logits_r, targets_r)

    # Tiny scalar epilogue (sum of per-(image, split) partials + dice/log).
    inter = jnp.sum(partials)
    numel = jnp.float32(N * H * W)                     # targets.numel()
    dice = 2.0 * inter / (inter + numel + jnp.float32(smooth))
    return -jnp.log(dice)


def _reference(logits, targets, num_classes, softmax_dim, smooth=1e-6):
    probs = logits
    if softmax_dim is not None:
        probs = jax.nn.softmax(logits, axis=softmax_dim)
    oh = jax.nn.one_hot(targets, num_classes, dtype=probs.dtype)   # (N,H,W,C)
    oh = jnp.transpose(oh, (0, 3, 1, 2))                           # (N,C,H,W)
    inter = jnp.sum(oh * probs)
    dice = 2.0 * inter / (inter + targets.size + smooth)
    return -jnp.log(dice)


if __name__ == "__main__":
    # MulticlassDiceLoss has no learnable parameters; nothing to initialize.
    key = jax.random.PRNGKey(0)
    k1, k2 = jax.random.split(key)
    N, C, H, W = 2, 4, 16, 16
    logits = jax.random.normal(k1, (N, C, H, W), dtype=jnp.float32)
    targets = jax.random.randint(k2, (N, H, W), 0, C, dtype=jnp.int32)

    ref = _reference(logits, targets, C, softmax_dim=1)

    # 1) softmax path, auto tiling (single full-row tile per image).
    loss = multiclass_dice_loss(logits, targets, num_classes=C, softmax_dim=1)
    loss = jax.block_until_ready(loss)
    assert jnp.allclose(loss, ref, rtol=1e-5, atol=1e-5), (loss, ref)

    # 2) softmax path, multi-tile accumulation (2 tiles, single split).
    loss2 = multiclass_dice_loss(logits, targets, num_classes=C, softmax_dim=1,
                                 tile_pixels=128, num_splits=1)
    loss2 = jax.block_until_ready(loss2)
    assert jnp.allclose(loss2, ref, rtol=1e-5, atol=1e-5), (loss2, ref)

    # 3) softmax path, parallel split axis (v7x-style 2-way split).
    loss3 = multiclass_dice_loss(logits, targets, num_classes=C, softmax_dim=1,
                                 tile_pixels=128, num_splits=2)
    loss3 = jax.block_until_ready(loss3)
    assert jnp.allclose(loss3, ref, rtol=1e-5, atol=1e-5), (loss3, ref)

    # 4) no-softmax path: feed positive probabilities so -log(dice) is finite
    #    (raw logits can make dice non-positive, matching the PyTorch NaN).
    probs = jax.nn.softmax(logits, axis=1)
    ref4 = _reference(probs, targets, C, softmax_dim=None)
    loss4 = multiclass_dice_loss(probs, targets, num_classes=C, softmax_dim=None,
                                 tile_pixels=128)
    loss4 = jax.block_until_ready(loss4)
    assert jnp.allclose(loss4, ref4, rtol=1e-5, atol=1e-5), (loss4, ref4)

    print("KERNEL_OK")
</pallas_src>

<mosaic_0001>
module attributes {stable_mosaic.version = 11 : i64} {
  func.func @_dice_intersection_kernel(%arg0: i32, %arg1: i32, %arg2: i32, %arg3: memref<1x4x256xf32, #tpu.memory_space<vmem>>, %arg4: memref<1x1x256xi32, #tpu.memory_space<vmem>>, %arg5: memref<1x1x1x1xf32, #tpu.memory_space<vmem>>, %arg6: memref<1x256xf32, #tpu.memory_space<vmem>>) attributes {dimension_semantics = [#tpu.dimension_semantics<parallel>, #tpu.dimension_semantics<parallel>, #tpu.dimension_semantics<arbitrary>], iteration_bounds = array<i64: 2, 1, 1>, scalar_prefetch = 0 : i64, scratch_operands = 1 : i64, tpu.core_type = #tpu.core_type<tc>, window_params = [{transform_indices = @transform_0, window_bounds = array<i64: 1, 4, 256>}, {transform_indices = @transform_1, window_bounds = array<i64: 1, 1, 256>}, {transform_indices = @transform_2, window_bounds = array<i64: 1, 1, 1, 1>}]} {
    %c0_i32 = arith.constant 0 : i32
    %0 = arith.cmpi eq, %arg2, %c0_i32 : i32
    %1 = arith.extui %0 : i1 to i32
    %c0_i32_0 = arith.constant 0 : i32
    %2 = arith.cmpi ne, %1, %c0_i32_0 : i32
    scf.if %2 {
      %cst_15 = arith.constant 0.000000e+00 : f32
      %28 = vector.broadcast %cst_15 : f32 to vector<1x256xf32>
      %c0_16 = arith.constant 0 : index
      %c0_17 = arith.constant 0 : index
      %29 = vector.load %arg6[%c0_16, %c0_17] : memref<1x256xf32, #tpu.memory_space<vmem>>, vector<1x256xf32>
      tpu.vector_store %arg6[%c0_16, %c0_17], %28 {strides = array<i32>} : memref<1x256xf32, #tpu.memory_space<vmem>>, vector<1x256xf32>,
    } else {
    }
    %c0 = arith.constant 0 : index
    %c0_1 = arith.constant 0 : index
    %c0_2 = arith.constant 0 : index
    %3 = vector.load %arg3[%c0, %c0_1, %c0_2] : memref<1x4x256xf32, #tpu.memory_space<vmem>>, vector<1x4x256xf32>
    %4 = vector.shape_cast %3 : vector<1x4x256xf32> to vector<4x256xf32>
    %c0_3 = arith.constant 0 : index
    %c0_4 = arith.constant 0 : index
    %c0_5 = arith.constant 0 : index
    %5 = vector.load %arg4[%c0_3, %c0_4, %c0_5] : memref<1x1x256xi32, #tpu.memory_space<vmem>>, vector<1x1x256xi32>
    %6 = vector.shape_cast %5 : vector<1x1x256xi32> to vector<1x256xi32>
    %7 = tpu.iota {dimensions = array<i32: 0>} : vector<4x256xi32>
    %8 = vector.broadcast %6 : vector<1x256xi32> to vector<4x256xi32>
    %9 = arith.cmpi eq, %7, %8 : vector<4x256xi32>
    %cst = arith.constant dense<0xFF800000> : vector<256xf32>
    %10 = vector.multi_reduction <maximumf>, %4, %cst [0] : vector<4x256xf32> to vector<256xf32>
    %11 = vector.shape_cast %10 : vector<256xf32> to vector<1x256xf32>
    %12 = vector.broadcast %11 : vector<1x256xf32> to vector<4x256xf32>
    %13 = arith.subf %4, %12 : vector<4x256xf32>
    %14 = math.exp %13 : vector<4x256xf32>
    %cst_6 = arith.constant dense<0.000000e+00> : vector<256xf32>
    %15 = vector.multi_reduction <add>, %14, %cst_6 [0] : vector<4x256xf32> to vector<256xf32>
    %16 = vector.shape_cast %15 : vector<256xf32> to vector<1x256xf32>
    %cst_7 = arith.constant 0.000000e+00 : f32
    %17 = vector.broadcast %cst_7 : f32 to vector<4x256xf32>
    %18 = arith.select %9, %14, %17 : vector<4x256xi1>, vector<4x256xf32>
    %cst_8 = arith.constant dense<0.000000e+00> : vector<256xf32>
    %19 = vector.multi_reduction <add>, %18, %cst_8 [0] : vector<4x256xf32> to vector<256xf32>
    %20 = vector.shape_cast %19 : vector<256xf32> to vector<1x256xf32>
    %21 = arith.divf %20, %16 : vector<1x256xf32>
    %c0_9 = arith.constant 0 : index
    %c0_10 = arith.constant 0 : index
    %22 = vector.load %arg6[%c0_9, %c0_10] : memref<1x256xf32, #tpu.memory_space<vmem>>, vector<1x256xf32>
    %23 = arith.addf %22, %21 : vector<1x256xf32>
    %c0_11 = arith.constant 0 : index
    %c0_12 = arith.constant 0 : index
    %24 = vector.load %arg6[%c0_11, %c0_12] : memref<1x256xf32, #tpu.memory_space<vmem>>, vector<1x256xf32>
    tpu.vector_store %arg6[%c0_11, %c0_12], %23 {strides = array<i32>} : memref<1x256xf32, #tpu.memory_space<vmem>>, vector<1x256xf32>,
    %c0_i32_13 = arith.constant 0 : i32
    %25 = arith.cmpi eq, %arg2, %c0_i32_13 : i32
    %26 = arith.extui %25 : i1 to i32
    %c0_i32_14 = arith.constant 0 : i32
    %27 = arith.cmpi ne, %26, %c0_i32_14 : i32
    scf.if %27 {
      %c0_15 = arith.constant 0 : index
      %c0_16 = arith.constant 0 : index
      %28 = vector.load %arg6[%c0_15, %c0_16] : memref<1x256xf32, #tpu.memory_space<vmem>>, vector<1x256xf32>
      %29 = vector.shape_cast %28 : vector<1x256xf32> to vector<1x1x256xf32>
      %cst_17 = arith.constant dense<0.000000e+00> : vector<1xf32>
      %30 = vector.multi_reduction <add>, %29, %cst_17 [1, 2] : vector<1x1x256xf32> to vector<1xf32>
      %31 = vector.shape_cast %30 : vector<1xf32> to vector<1x1x1xf32>
      %32 = vector.extract %31[0, 0, 0] : f32 from vector<1x1x1xf32>
      %33 = vector.broadcast %32 : f32 to vector<1x1x1x1xf32>
      %c0_18 = arith.constant 0 : index
      %c0_19 = arith.constant 0 : index
      %c0_20 = arith.constant 0 : index
      %c0_21 = arith.constant 0 : index
      %34 = vector.load %arg5[%c0_18, %c0_19, %c0_20, %c0_21] : memref<1x1x1x1xf32, #tpu.memory_space<vmem>>, vector<1x1x1x1xf32>
      tpu.vector_store %arg5[%c0_18, %c0_19, %c0_20, %c0_21], %33 {strides = array<i32>} : memref<1x1x1x1xf32, #tpu.memory_space<vmem>>, vector<1x1x1x1xf32>,
    } else {
    }
    return
  }
  func.func @transform_0(%arg0: i32, %arg1: i32, %arg2: i32) -> (i32, i32, i32) {
    %c1_i32 = arith.constant 1 : i32
    %0 = arith.muli %arg1, %c1_i32 : i32
    %1 = arith.addi %0, %arg2 : i32
    %c0_i32 = arith.constant 0 : i32
    %c0_i32_0 = arith.constant 0 : i32
    return %arg0, %c0_i32, %1 : i32, i32, i32
  }
  func.func @transform_1(%arg0: i32, %arg1: i32, %arg2: i32) -> (i32, i32, i32) {
    %c1_i32 = arith.constant 1 : i32
    %0 = arith.muli %arg1, %c1_i32 : i32
    %1 = arith.addi %0, %arg2 : i32
    %c0_i32 = arith.constant 0 : i32
    %c0_i32_0 = arith.constant 0 : i32
    return %arg0, %c0_i32, %1 : i32, i32, i32
  }
  func.func @transform_2(%arg0: i32, %arg1: i32, %arg2: i32) -> (i32, i32, i32, i32) {
    %c0_i32 = arith.constant 0 : i32
    %c0_i32_0 = arith.constant 0 : i32
    %c0_i32_1 = arith.constant 0 : i32
    return %arg0, %arg1, %c0_i32, %c0_i32_0 : i32, i32, i32, i32
  }
}

</mosaic_0001>

<bundles_post_ra>
// kernel: tpu_custom_call.1
= control target key start
LH: loop header
LB: loop body
LE: loop exit
PB: predicated region body
PF: predicated region fallthrough
CT: control target
= control target key end

     0   :  { %7 = vsyncpa [#allocation4], 0  ;;  %s854_s0 = inlined_call_operand.hbm [shape: f32[2,4,256], index: 0, kind: input, shape index: {}]   ;;  %s855_s1 = inlined_call_operand.hbm [shape: s32[2,1,256], index: 1, kind: input, shape index: {}]   ;;  %s856_s2 = inlined_call_operand.vmem [shape: f32[2,1,1,1], index: 2, kind: output, shape index: {}]  }
   0x1   :  { %9 = vsyncpa [#allocation4 + $0x1], 0 }
   0x2   :  { %10 = vsyncpa [#allocation6], 0 }
   0x3   :  { %12 = vsyncpa [#allocation6 + $0x1], 0  ;;  %s712_s9 = smov 0   ;;  %s714_s10 = smov 0  }
   0x4   :  { %s716_s11 = smov 0   ;;  %s718_s12 = smov 0  }
   0x5   :  { %s720_s13 = smov 0   ;;  %s722_s14 = smov 0  }
   0x6 LB: > { %s493_s15 = sadd.s32 4294967295, %s691_s14   ;;  %s37_s16 = sadd.s32 1, %s687_s13  ;;  %s691_s14 = sphi %s722_s14, %s18_s14   ;;  %s687_s13 = sphi %s720_s13, %s867_s13   ;;  %s683_s12 = sphi %s718_s12, %s866_s12   ;;  %s679_s11 = sphi %s716_s11, %s865_s11   ;;  %s675_s10 = sphi %s714_s10, %s864_s10   ;;  %s671_s9 = sphi %s712_s9, %s863_s9  }
   0x7   : > { %p39_p0 = scmp.ge.s32.totalorder %s37_s16, 2  ;;  %s48_s17 = sadd.s32 1, %s679_s11 }
   0x8   : > { %p55_p1 = scmp.ne.s32.totalorder %s679_s11, %s675_s10  ;;  %p56_p2 = scmp.eq.s32.totalorder %s691_s14, 0 }
   0x9   : > { %s869_s16 = smov (%p39_p0, %s37_s16), 0  ;;  %p61_p4 = scmp.ne.s32.totalorder %s675_s10, %s671_s9 }
   0xa   : > { %p748_p3 = por %p56_p2, %p55_p1  ;;  %s43_s19 = ssub.s32 %s687_s13, %s869_s16 }
   0xb   : > { %p62_p5 = scmp.eq.s32.totalorder %s493_s15, 0  ;;  %p46_p6 = scmp.eq.s32.totalorder %s43_s19, 0 }
   0xc   : > { %p523_p8 = scmp.lt.s32.totalorder %s691_s14, 2  ;;  %s764_s22 = sand.u32 1, %s679_s11  }
   0xd   : > { %p755_p7 = por %p62_p5, %p61_p4  ;;  %s508_s23 = sshll.u32 %s687_s13, 7 }
   0xe   : > { %s761_s21 = scalar_select %p46_p6, %s679_s11, %s48_s17  }
   0xf   : > { %s497_s24 = sshll.u32 %s764_s22, 3  ;;  %s156_s27 = scalar_lea.hbm %s854_s0, %s508_s23 }
  0x10   : > { %s147_s28 = scalar_lea.vmem [#allocation3], %s497_s24  ;;  %p773_p9 = pnand %p523_p8, %p748_p3 }
  0x11   : > { %s158_s29 = sshll.u32 %s147_s28, 4  ;;  %p503_p10 = scmp.ge.s32.totalorder %s691_s14, 1  ;;  %s159_s29 = int_to_ptr.vmem [resolvable:$true] %s158_s29 }
  0x12   : > { %p185_p11 = scmp.lt.s32.totalorder %s691_s14, 3  ;;  %s144_s3 = scalar_lea.sflag [#allocation4], %s764_s22 }
  0x13   : > { %p583_p12 = pneg %p773_p9  ;;  %s594_s4 = scalar_lea.vmem %s159_s29, 128 }
  0x14   : > { %p595_p13 = scmp.ne.s32.totalorder %s159_s29, %s594_s4  ;;  %s693_s5 = smov [#allocation3]  }
  0x15   : > { %s599_s6 = sshll.u32 %s693_s5, 4  ;;  %s600_s6 = int_to_ptr.vmem [resolvable:$false] %s599_s6 }
  0x16   : > { %p597_p0 = pnand %p595_p13, %p583_p12  ;;  %s601_s7 = scalar_lea.vmem %s600_s6, 256 }
  0x17   : > { %p602_p2 = scmp.lt.s32.totalorder %s159_s29, %s600_s6  ;;  %p603_p3 = scmp.lt.s32.totalorder %s601_s7, %s594_s4 }
  0x18   : > { %p598_p1 = pneg %p597_p0 }
  0x19   : > { %p604_p4 = por %p603_p3, %p602_p2 }
  0x1b   : > { %p605_p5 = pnand %p604_p4, %p598_p1 }
  0x1d   : > { %608 = shalt.err (!%p605_p5)
}
  0x1e   : > { %519 = dma.hbm_to_vmem [thread:$0]  (!%p773_p9), %s156_s27, 128, %s159_s29, %s144_s3  }
  0x1f   : > { %p791_p6 = pnand %p503_p10, %p185_p11  ;;  %s500_s9 = sshll.u32 %s764_s22, 1 }
  0x20   : > { %s509_s15 = sshll.u32 %s687_s13, 5  ;;  %s169_s23 = scalar_lea.vmem [#allocation5], %s500_s9 }
  0x21   : > { %s178_s19 = scalar_lea.hbm %s855_s1, %s509_s15  ;;  %s180_s24 = sshll.u32 %s169_s23, 4  ;;  %s181_s24 = int_to_ptr.vmem [resolvable:$true] %s180_s24 }
  0x22   : > { %s166_s25 = scalar_lea.sflag [#allocation6], %s764_s22  ;;  %s622_s26 = scalar_lea.vmem %s181_s24, 32 }
  0x23   : > { %p623_p8 = scmp.ne.s32.totalorder %s181_s24, %s622_s26  ;;  %s694_s27 = smov [#allocation5]  }
  0x24   : > { %s627_s28 = sshll.u32 %s694_s27, 4  ;;  %s628_s28 = int_to_ptr.vmem [resolvable:$false] %s627_s28 }
  0x25   : > { %p625_p13 = pnand %p623_p8, %p583_p12  ;;  %s629_s29 = scalar_lea.vmem %s628_s28, 64 }
  0x26   : > { %p630_p10 = scmp.lt.s32.totalorder %s181_s24, %s628_s28  ;;  %p631_p11 = scmp.lt.s32.totalorder %s629_s29, %s622_s26 }
  0x27   : > { %p626_p0 = pneg %p625_p13 }
  0x28   : > { %p632_p1 = por %p631_p11, %p630_p10 }
  0x2a   : > { %p633_p2 = pnand %p632_p1, %p626_p0 }
  0x2c   : > { %636 = shalt.err (!%p633_p2)
}
  0x2d   : > { %522 = dma.hbm_to_vmem [thread:$0]  (!%p773_p9), %s178_s19, 32, %s181_s24, %s166_s25  }
  0x2e   : > { %189 = sbr.rel (%p791_p6) target bundleno = 345 (0x159), region = 28  ;;  %s191_s22 = sand.u32 (!%p791_p6), 1, %s675_s10  }
  0x2f   : > { %s504_s3 = sshll.u32 (!%p791_p6), %s191_s22, 3  ;;  %s192_s4 = scalar_lea.sflag (!%p791_p6), [#allocation4], %s191_s22 }
  0x30   : > { %s195_s5 = scalar_lea.vmem (!%p791_p6), [#allocation3], %s504_s3 }
  0x33   : > { %662 = dma.done.wait (%p755_p7), %s192_s4, 128  }
  0x34   : > { %664 = vsyncadd (%p755_p7), %s192_s4, 4294967168  ;;  %s505_s6 = sshll.u32 %s191_s22, 1  ;;  %s201_s7 = scalar_lea.sflag [#allocation6], %s191_s22 }
  0x35   : > { %s204_s9 = scalar_lea.vmem [#allocation5], %s505_s6 }
  0x36   : > { %666 = dma.done.wait (%p755_p7), %s201_s7, 32  }
  0x37   : > { %668 = vsyncadd (%p755_p7), %s201_s7, 4294967264  ;;  %v245_v0 = vlaneseq  ;;  %v695_v2 = vmov 0.0   ;;  %vm267_vm1 = vcmask 1043456   ;;  %v250_v3 = vld [vmem:[%s195_s5] sm:$0xff]  ;;  %v251_v24 = vld [vmem:[%s204_s9] sm:$0x3] }
  0x38   : > { %v265_v4 = vcombine.high %v250_v3, %v250_v3  ;;  %v268_v5 = vsel %vm267_vm1, %v250_v3, -inf  ;;  %v696_v58 = vmov 1966171168   ;;  %vm366_vm4 = vcmask 1040384   ;;  %p235_p7 = scmp.lt.s32.totalorder %s683_s12, 1 }
  0x39   : > { %vm817_vm0 = vcmp.lt.s32.totalorder %v245_v0, 256  ;;  %v269_v6 = vrot.slane %v268_v5, 4  ;;  %v253_v22 = vshrl.u32 %v245_v0, 7  ;;  %v331_v59 = vunpack.c.l.s4 %v696_v58 }
  0x3a   : > { %249 = vst.msk [vmem:[#allocation2] sm:$0x3] %vm817_vm0, %v695_v2  ;;  %v275_v7 = vsel %vm267_vm1, %v265_v4, -inf  ;;  %s871_s12 = smov (!%p235_p7, %s683_s12), 1  ;;  %vm380_vm5 = vcmask 0  }
  0x3b   : > { %v270_v8 = vmax.f32 %v268_v5, %v269_v6  ;;  %v276_v9 = vrot.slane %v275_v7, 4  ;;  %v256_v23 = vsub.s32 0, %v253_v22  ;;  %v260_v25 = vsub.s32 1, %v253_v22  ;;  %s240_s8 = scalar_lea.vmem %s856_s2, %s871_s12 }
  0x3c   : > { %v332_v62 = vunpack.c.0.s8 %v331_v59 }
  0x3d   : > { %v271_v10 = vrot.slane %v270_v8, 2  ;;  %v277_v11 = vmax.f32 %v275_v7, %v276_v9  ;;  %v257_v26 = vrot.slane %v251_v24, %v256_v23  ;;  %v261_v27 = vrot.slane %v251_v24, %v260_v25 }
  0x3e   : > { %v335_v4 = vsub.s32 %v332_v62, %v253_v22 }
  0x3f   : > { %v272_v12 = vmax.f32 %v270_v8, %v271_v10  ;;  %v278_v13 = vrot.slane %v277_v11, 2  ;;  %vm262_vm2 = vcmp.eq.s32.totalorder %v253_v22, %v257_v26  ;;  %vm263_vm3 = vcmp.eq.s32.totalorder %v253_v22, %v261_v27 }
  0x41   : > { %v273_v14 = vrot.slane %v272_v12, 1  ;;  %v279_v15 = vmax.f32 %v277_v11, %v278_v13  ;;  %v326_v7 = vld [vmem:[#allocation2] sm:$0x3] }
  0x43   : > { %v274_v16 = vmax.f32 %v272_v12, %v273_v14  ;;  %v280_v17 = vrot.slane %v279_v15, 1 }
  0x45   : > { %v281_v18 = vmax.f32 %v279_v15, %v280_v17 }
  0x47   : > { %v284_v19 = vcombine.low %v274_v16, %v281_v18 }
  0x49   : > { %v286_v20 = vsub.f32 %v250_v3, %v284_v19 }
  0x4b   : > { %v287_v21 = vmul.f32 1.442695, %v286_v20 }
  0x4d   : > { %575 = vpow2.f32 %v287_v21 }
  0x5a   : > { %v576_v28 = vpop.eup %575 }
  0x5b   : > { %v290_v29 = vcombine.high %v576_v28, %v576_v28  ;;  %v292_v30 = vsel %vm267_vm1, %v576_v28, 0.0  ;;  %v306_v31 = vsel %vm262_vm2, %v576_v28, 0.0 }
  0x5c   : > { %v293_v32 = vrot.slane %v292_v30, 4  ;;  %v308_v33 = vsel %vm267_vm1, %v306_v31, 0.0 }
  0x5d   : > { %v299_v34 = vsel %vm267_vm1, %v290_v29, 0.0  ;;  %v307_v35 = vsel %vm263_vm3, %v290_v29, 0.0  ;;  %v309_v38 = vrot.slane %v308_v33, 4 }
  0x5e   : > { %v294_v36 = vadd.f32 %v293_v32, %v292_v30  ;;  %v300_v37 = vrot.slane %v299_v34, 4  ;;  %v315_v39 = vsel %vm267_vm1, %v307_v35, 0.0 }
  0x5f   : > { %v316_v42 = vrot.slane %v315_v39, 4  ;;  %v310_v45 = vadd.f32 %v309_v38, %v308_v33 }
  0x60   : > { %v295_v40 = vrot.slane %v294_v36, 2  ;;  %v301_v41 = vadd.f32 %v300_v37, %v299_v34 }
  0x61   : > { %v317_v48 = vadd.f32 %v316_v42, %v315_v39  ;;  %v311_v51 = vrot.slane %v310_v45, 2 }
  0x62   : > { %v296_v43 = vadd.f32 %v295_v40, %v294_v36  ;;  %v302_v44 = vrot.slane %v301_v41, 2 }
  0x63   : > { %v318_v53 = vrot.slane %v317_v48, 2  ;;  %v312_v54 = vadd.f32 %v311_v51, %v310_v45 }
  0x64   : > { %v297_v46 = vrot.slane %v296_v43, 1  ;;  %v303_v47 = vadd.f32 %v302_v44, %v301_v41 }
  0x65   : > { %v319_v55 = vadd.f32 %v318_v53, %v317_v48  ;;  %v313_v56 = vrot.slane %v312_v54, 1 }
  0x66   : > { %v298_v49 = vadd.f32 %v297_v46, %v296_v43  ;;  %v304_v50 = vrot.slane %v303_v47, 1 }
  0x67   : > { %v320_v57 = vrot.slane %v319_v55, 1  ;;  %v314_v60 = vadd.f32 %v313_v56, %v312_v54 }
  0x68   : > { %v305_v52 = vadd.f32 %v304_v50, %v303_v47  ;;  %577 = vrcp.f32 %v298_v49 }
  0x69   : > { %v321_v61 = vadd.f32 %v320_v57, %v319_v55 }
  0x6a   : > { %579 = vrcp.f32 %v305_v52 }
  0x75   : > { %v578_v63 = vpop.eup %577 }
  0x76   : > { %v323_v0 = vmul.f32 %v578_v63, %v314_v60 }
  0x77   : > { %v580_v2 = vpop.eup %579 }
  0x78   : > { %v325_v3 = vmul.f32 %v580_v2, %v321_v61 }
  0x7a   : > { %v329_v5 = vcombine.low %v323_v0, %v325_v3 }
  0x7c   : > { %v336_v6 = vrot.slane %v329_v5, %v335_v4 }
  0x7e   : > { %v343_v8 = vrot.slane %v336_v6, %v335_v4 }
  0x80   : > { %v345_v9 = vadd.f32 %v343_v8, %v326_v7 }
  0x82   : > { %350 = vst.msk [vmem:[#allocation2] sm:$0x3] %vm817_vm0, %v345_v9 }
  0x89   : > { %v354_v10 = vld [vmem:[#allocation2] sm:$0x3] }
  0x8a   : > { %v359_v11 = vrot.slane %v354_v10, %v256_v23  ;;  %v363_v12 = vrot.slane %v354_v10, %v260_v25 }
  0x8c   : > { %v367_v13 = vsel %vm366_vm4, %v359_v11, 0.0  ;;  %v368_v14 = vsel %vm366_vm4, %v363_v12, 0.0 }
  0x8d   : > { %v369_v15 = vadd.f32 %v368_v14, %v367_v13 }
  0x8f   : > { %370 = vadd.xlane.f32.xlu0 %v369_v15 }
 0x118   : > { %v371_v16 = vpop.xlane.xlu0 %370 }
 0x119   : > { %v372_v17 = vrot.slane %v371_v16, 4 }
 0x11b   : > { %v373_v18 = vadd.f32 %v372_v17, %v371_v16 }
 0x11d   : > { %v374_v19 = vrot.slane %v373_v18, 2 }
 0x11f   : > { %v375_v20 = vadd.f32 %v374_v19, %v373_v18 }
 0x121   : > { %v376_v21 = vrot.slane %v375_v20, 1 }
 0x123   : > { %v377_v22 = vadd.f32 %v376_v21, %v375_v20 }
 0x125   : > { %510 = vpush %v377_v22 }
 0x156   : > { %s511_s15 = spop %510 }
 0x157   : > { %v379_v1 = vstv %s511_s15 }
 0x158   : > { %381 = vst.msk [vmem:[%s240_s8] sm:$0x1] %vm380_vm5, %v379_v1 }
 0x159 PF: > { %s18_s14 = sadd.s32 1, %s691_s14   ;;  %s863_s9 = smov %s675_s10 }
 0x15a   : > { %p15_p9 = scmp.ge.s32.totalorder %s18_s14, 4   ;;  %s864_s10 = smov %s679_s11 }
 0x15b   : > { %s865_s11 = smov %s761_s21  ;;  %s866_s12 = smov %s687_s13 }
 0x15c   : > { %s867_s13 = smov %s869_s16  ;;  %17 = sbr.rel (!%p15_p9) target bundleno = 6 (0x6), region = 89 }
 0x161   :  { %405 = vsyncpa [#allocation4], 1 }
 0x162   :  { %407 = vsyncpa [#allocation4 + $0x1], 1 }
 0x163   :  { %408 = vsyncpa [#allocation6], 1 }
 0x164   :  { %410 = vsyncpa [#allocation6 + $0x1], 1 }

</bundles_post_ra>
